<compile_context>
chip_gen: v7x
topology: tpu7x:2x2x1
jax: 0.10.0
libtpu: 0.0.40
codegen_flags: <defaults>
</compile_context>

<pallas_src>
import functools

import jax
import jax.numpy as jnp
from jax import lax
from jax.experimental import pallas as pl
from jax.experimental.pallas import tpu as pltpu

EPS = 1e-5  # PyTorch BatchNorm1d default eps


# ----------------------------------------------------------------------------
# Pallas kernel: one batch element per grid step, whole temporal block fused.
# ----------------------------------------------------------------------------
def temporal_block_kernel(x_ref, w1d_ref, w2_ref, p_ref, out_ref,
                          xcol_ref, hcol_ref, *, K, dilation, pad):
    # x_ref block: (1, Cin, L) bf16, time on the 128-lane axis.
    x = x_ref[0]                                    # (Cin, L) bf16
    Cin, L = x.shape
    Cout = w2_ref.shape[0]

    def fill_cols(col_ref, v):
        # im2col into persistent VMEM scratch: row-block k = v right-shifted by
        # (pad - k*dilation) lanes with the causal zero head written in-kernel
        # (nothing round-trips through HBM, no full activation copy).
        C, Lv = v.shape
        for k in range(K):                          # K is small & static
            s = pad - k * dilation                  # causal right-shift, >= 0
            r = k * C
            if s == 0:
                col_ref[r:r + C, 0:Lv] = v
            else:
                col_ref[r:r + C, 0:s] = jnp.zeros((C, s), v.dtype)
                col_ref[r:r + C, s:Lv] = v[:, 0:Lv - s]

    # ---- conv1 AND 1x1 downsample: ONE fused bf16 MXU matmul ----------------
    # w1d stacks [w1 ; 0...0|wd]; the wd columns line up with the unshifted
    # tap rows of the im2col slab, so rows [Cout:] are exactly wd @ x.
    fill_cols(xcol_ref, x)
    a = jnp.dot(w1d_ref[...], xcol_ref[...], preferred_element_type=jnp.float32)
    acc = a[Cout:, :] + p_ref[:, 6:7]               # downsample + bd (residual)
    a1 = jnp.maximum(a[:Cout, :] + p_ref[:, 0:1], 0.0)        # + b1, ReLU
    h = (p_ref[:, 1:2] * a1 + p_ref[:, 2:3]).astype(x.dtype)  # BN1 FMA -> bf16
    # TODO(synk): Dropout is identity here (eval mode); training-mode dropout
    # RNG masks and training-mode BatchNorm batch statistics are not reproduced.

    # ---- conv2 -> ReLU -> BN2, accumulated straight onto the residual -------
    fill_cols(hcol_ref, h)
    a2 = jnp.dot(w2_ref[...], hcol_ref[...], preferred_element_type=jnp.float32)
    a2 = jnp.maximum(a2 + p_ref[:, 3:4], 0.0)       # + b2, ReLU
    acc = acc + p_ref[:, 4:5] * a2 + p_ref[:, 5:6]  # BN2 FMA onto residual

    out_ref[0] = jnp.maximum(acc, 0.0).astype(out_ref.dtype)


# ----------------------------------------------------------------------------
# Wrapper: NCL in, NCL out — no transposes, no HBM-side padding.
# ----------------------------------------------------------------------------
def temporal_block(x_ncl, kp, *, kernel_size, dilation, padding):
    B, Cin, L = x_ncl.shape
    Cout = kp["w2"].shape[0]
    x_bf = x_ncl.astype(jnp.bfloat16)               # bf16 HBM traffic + bf16 MXU

    # Constant-index parameter blocks: Pallas keeps revisited blocks resident,
    # so they are fetched once and not re-DMA'd per grid step.
    def full2d(a):
        return pl.BlockSpec(a.shape, lambda b: (0, 0))

    in_specs = [pl.BlockSpec((1, Cin, L), lambda b: (b, 0, 0)),
                full2d(kp["w1d"]), full2d(kp["w2"]), full2d(kp["p"])]

    kernel = functools.partial(temporal_block_kernel, K=kernel_size,
                               dilation=dilation, pad=padding)

    # TODO(synk): for realistic L on v7x (64 MiB VMEM), add a second "parallel"
    # grid axis tiling L in 128-multiples with a 2*padding halo (and set
    # vmem_limit_bytes); at this demo L (=32, below one lane tile) the
    # (8,128)-block rule forces a single full-L block per batch element.
    # TODO(synk): Cin == Cout (no downsample, identity residual) path not
    # specialized; the module in this configuration always has a downsample.
    return pl.pallas_call(
        kernel,
        out_shape=jax.ShapeDtypeStruct((B, Cout, L), jnp.float32),
        grid_spec=pltpu.PrefetchScalarGridSpec(
            num_scalar_prefetch=0,
            grid=(B,),
            in_specs=in_specs,
            out_specs=pl.BlockSpec((1, Cout, L), lambda b: (b, 0, 0)),
            scratch_shapes=[
                pltpu.VMEM((kernel_size * Cin, L), jnp.bfloat16),   # im2col(x)
                pltpu.VMEM((kernel_size * Cout, L), jnp.bfloat16),  # im2col(h)
            ]),
        compiler_params=pltpu.CompilerParams(
            dimension_semantics=("parallel",)),
    )(x_bf, kp["w1d"], kp["w2"], kp["p"])


# ----------------------------------------------------------------------------
# Deterministic parameter construction (mirrors module __init__ shapes)
# ----------------------------------------------------------------------------
def make_params(key, n_inputs, n_outputs, kernel_size):
    ks = jax.random.split(key, 6)

    def weight_norm_weight(k, out_c, in_c, kk):
        # weight_norm(v) with g initialized to ||v|| per output channel:
        # the effective conv weight at init is exactly v.
        return 0.01 * jax.random.normal(k, (out_c, in_c, kk), jnp.float32)

    def conv_bias(k, out_c, fan_in):
        bound = 1.0 / jnp.sqrt(fan_in)
        return jax.random.uniform(k, (out_c,), jnp.float32, -bound, bound)

    # bf16-round the conv weights once: the kernel consumes bf16 (MXU-native);
    # the f32 reference consumes the same rounded values so the comparison
    # isolates kernel correctness (accumulation stays f32 in both).
    def bf16_round(a):
        return a.astype(jnp.bfloat16).astype(jnp.float32)

    w1 = bf16_round(weight_norm_weight(ks[0], n_outputs, n_inputs, kernel_size))
    b1 = conv_bias(ks[1], n_outputs, n_inputs * kernel_size)
    w2 = bf16_round(weight_norm_weight(ks[2], n_outputs, n_outputs, kernel_size))
    b2 = conv_bias(ks[3], n_outputs, n_outputs * kernel_size)
    wd = bf16_round(0.01 * jax.random.normal(ks[4], (n_outputs, n_inputs, 1),
                                             jnp.float32))
    bd = conv_bias(ks[5], n_outputs, n_inputs)

    # Fresh BatchNorm1d running stats / affine (eval mode), pre-folded.
    gamma = jnp.ones((n_outputs,), jnp.float32)
    beta = jnp.zeros((n_outputs,), jnp.float32)
    mean = jnp.zeros((n_outputs,), jnp.float32)
    var = jnp.ones((n_outputs,), jnp.float32)
    scale1 = gamma * lax.rsqrt(var + EPS)
    shift1 = beta - mean * scale1
    scale2, shift2 = scale1, shift1

    def to_2d(w_oih):  # (O, I, K) -> (O, K*I), rows grouped by tap k
        O, I, K = w_oih.shape
        return jnp.transpose(w_oih, (0, 2, 1)).reshape(O, K * I)

    # Stack the 1x1 downsample below conv1, aligned with the UNSHIFTED tap
    # (k = K-1: causal padding = (K-1)*dilation => shift 0), so conv1 and the
    # downsample share one im2col RHS and one MXU matmul in the kernel.
    w1_2d = to_2d(w1)                                        # (Cout, K*Cin)
    wd_2d = wd[:, :, 0]                                      # (Cout, Cin)
    wd_row = jnp.concatenate(
        [jnp.zeros((n_outputs, (kernel_size - 1) * n_inputs), jnp.float32),
         wd_2d], axis=1)                                     # (Cout, K*Cin)
    w1d = jnp.concatenate([w1_2d, wd_row], axis=0)           # (2*Cout, K*Cin)

    # Single packed per-channel parameter slab: [b1,s1,sh1,b2,s2,sh2,bd,0]
    p = jnp.stack([b1, scale1, shift1, b2, scale2, shift2, bd,
                   jnp.zeros_like(bd)], axis=1)              # (Cout, 8) f32

    params_kernel = dict(
        w1d=w1d.astype(jnp.bfloat16),                        # (2*Cout, K*Cin)
        w2=to_2d(w2).astype(jnp.bfloat16),                   # (Cout, K*Cout)
        p=p)
    params_torch = dict(w1=w1, b1=b1, w2=w2, b2=b2, wd=wd, bd=bd)
    return params_kernel, params_torch


# ----------------------------------------------------------------------------
# Pure-JAX reference (mirrors the PyTorch forward, NCL layout, f32)
# ----------------------------------------------------------------------------
def ref_forward(x_ncl, pt, *, kernel_size, dilation, padding):
    def conv1d(x, w_oih, b, pad, dil):
        y = lax.conv_general_dilated(
            x, w_oih, window_strides=(1,), padding=[(pad, pad)],
            rhs_dilation=(dil,), dimension_numbers=("NCH", "OIH", "NCH"),
            precision=lax.Precision.HIGHEST)
        return y + b[None, :, None]

    def bn(y):  # eval-mode BN with default running stats / affine
        return (y - 0.0) / jnp.sqrt(1.0 + EPS)

    res = conv1d(x_ncl, pt["wd"], pt["bd"], 0, 1)
    y = conv1d(x_ncl, pt["w1"], pt["b1"], padding, dilation)[:, :, :-padding]
    y = bn(jnp.maximum(y, 0.0))
    y = conv1d(y, pt["w2"], pt["b2"], padding, dilation)[:, :, :-padding]
    y = bn(jnp.maximum(y, 0.0))
    return jnp.maximum(y + res, 0.0)


if __name__ == "__main__":
    B, Cin, Cout, L = 2, 8, 16, 32
    kernel_size, stride, dilation = 3, 1, 2
    padding = (kernel_size - 1) * dilation          # causal TCN padding

    key = jax.random.PRNGKey(0)
    kx, kp = jax.random.split(key)
    x = jax.random.normal(kx, (B, Cin, L), jnp.float32)      # NCL like PyTorch
    # bf16-round the input once: kernel uses bf16, reference the same values
    # in f32, so only f32-accumulation order differs between the two.
    x = x.astype(jnp.bfloat16).astype(jnp.float32)

    params_kernel, params_torch = make_params(kp, Cin, Cout, kernel_size)

    out = temporal_block(x, params_kernel, kernel_size=kernel_size,
                         dilation=dilation, padding=padding)
    out = jax.block_until_ready(out)

    ref = ref_forward(x, params_torch, kernel_size=kernel_size,
                      dilation=dilation, padding=padding)
    assert out.shape == (B, Cout, L), out.shape
    err = float(jnp.max(jnp.abs(out - ref)))
    assert jnp.allclose(out, ref, atol=2e-3, rtol=2e-3), err

    print("KERNEL_OK")
</pallas_src>

<mosaic_0001>
module attributes {stable_mosaic.version = 11 : i64} {
  func.func @temporal_block_kernel(%arg0: i32, %arg1: memref<1x8x32xbf16, #tpu.memory_space<vmem>>, %arg2: memref<32x24xbf16, #tpu.memory_space<vmem>>, %arg3: memref<16x48xbf16, #tpu.memory_space<vmem>>, %arg4: memref<16x8xf32, #tpu.memory_space<vmem>>, %arg5: memref<1x16x32xf32, #tpu.memory_space<vmem>>, %arg6: memref<24x32xbf16, #tpu.memory_space<vmem>>, %arg7: memref<48x32xbf16, #tpu.memory_space<vmem>>) attributes {dimension_semantics = [#tpu.dimension_semantics<parallel>], iteration_bounds = array<i64: 2>, scalar_prefetch = 0 : i64, scratch_operands = 2 : i64, tpu.core_type = #tpu.core_type<tc>, window_params = [{transform_indices = @transform_0, window_bounds = array<i64: 1, 8, 32>}, {pipeline_mode = #tpu.pipeline_mode<synchronous>, transform_indices = @transform_1, window_bounds = array<i64: 32, 24>}, {pipeline_mode = #tpu.pipeline_mode<synchronous>, transform_indices = @transform_2, window_bounds = array<i64: 16, 48>}, {pipeline_mode = #tpu.pipeline_mode<synchronous>, transform_indices = @transform_3, window_bounds = array<i64: 16, 8>}, {transform_indices = @transform_4, window_bounds = array<i64: 1, 16, 32>}]} {
    %c0 = arith.constant 0 : index
    %c0_0 = arith.constant 0 : index
    %c0_1 = arith.constant 0 : index
    %0 = vector.load %arg1[%c0, %c0_0, %c0_1] : memref<1x8x32xbf16, #tpu.memory_space<vmem>>, vector<1x8x32xbf16>
    %1 = vector.shape_cast %0 : vector<1x8x32xbf16> to vector<8x32xbf16>
    %cst = arith.constant 0.000000e+00 : bf16
    %2 = vector.broadcast %cst : bf16 to vector<8x4xbf16>
    %c0_2 = arith.constant 0 : index
    %c0_3 = arith.constant 0 : index
    %3 = vector.load %arg6[%c0_2, %c0_3] : memref<24x32xbf16, #tpu.memory_space<vmem>>, vector<8x4xbf16>
    tpu.vector_store %arg6[%c0_2, %c0_3], %2 {strides = array<i32>} : memref<24x32xbf16, #tpu.memory_space<vmem>>, vector<8x4xbf16>,
    %4 = vector.extract_strided_slice %1 {offsets = [0, 0], sizes = [8, 28], strides = [1, 1]} : vector<8x32xbf16> to vector<8x28xbf16>
    %c0_4 = arith.constant 0 : index
    %c4 = arith.constant 4 : index
    %5 = vector.load %arg6[%c0_4, %c4] : memref<24x32xbf16, #tpu.memory_space<vmem>>, vector<8x28xbf16>
    tpu.vector_store %arg6[%c0_4, %c4], %4 {strides = array<i32>} : memref<24x32xbf16, #tpu.memory_space<vmem>>, vector<8x28xbf16>,
    %cst_5 = arith.constant 0.000000e+00 : bf16
    %6 = vector.broadcast %cst_5 : bf16 to vector<8x2xbf16>
    %c8 = arith.constant 8 : index
    %c0_6 = arith.constant 0 : index
    %7 = vector.load %arg6[%c8, %c0_6] : memref<24x32xbf16, #tpu.memory_space<vmem>>, vector<8x2xbf16>
    tpu.vector_store %arg6[%c8, %c0_6], %6 {strides = array<i32>} : memref<24x32xbf16, #tpu.memory_space<vmem>>, vector<8x2xbf16>,
    %8 = vector.extract_strided_slice %1 {offsets = [0, 0], sizes = [8, 30], strides = [1, 1]} : vector<8x32xbf16> to vector<8x30xbf16>
    %c8_7 = arith.constant 8 : index
    %c2 = arith.constant 2 : index
    %9 = vector.load %arg6[%c8_7, %c2] : memref<24x32xbf16, #tpu.memory_space<vmem>>, vector<8x30xbf16>
    tpu.vector_store %arg6[%c8_7, %c2], %8 {strides = array<i32>} : memref<24x32xbf16, #tpu.memory_space<vmem>>, vector<8x30xbf16>,
    %c16 = arith.constant 16 : index
    %c0_8 = arith.constant 0 : index
    %10 = vector.load %arg6[%c16, %c0_8] : memref<24x32xbf16, #tpu.memory_space<vmem>>, vector<8x32xbf16>
    tpu.vector_store %arg6[%c16, %c0_8], %1 {strides = array<i32>} : memref<24x32xbf16, #tpu.memory_space<vmem>>, vector<8x32xbf16>,
    %c0_9 = arith.constant 0 : index
    %c0_10 = arith.constant 0 : index
    %11 = vector.load %arg2[%c0_9, %c0_10] : memref<32x24xbf16, #tpu.memory_space<vmem>>, vector<32x24xbf16>
    %c0_11 = arith.constant 0 : index
    %c0_12 = arith.constant 0 : index
    %12 = vector.load %arg6[%c0_11, %c0_12] : memref<24x32xbf16, #tpu.memory_space<vmem>>, vector<24x32xbf16>
    %cst_13 = arith.constant dense<0.000000e+00> : vector<32x32xf32>
    %13 = tpu.matmul %11, %12, %cst_13 {dimension_numbers = #tpu.dot_dimension_numbers<[1], [0], [0], [1], [0, 0, 1, 1], [], []>} : vector<32x24xbf16>, vector<24x32xbf16>, vector<32x32xf32> -> vector<32x32xf32>
    %14 = vector.extract_strided_slice %13 {offsets = [16, 0], sizes = [16, 32], strides = [1, 1]} : vector<32x32xf32> to vector<16x32xf32>
    %c0_14 = arith.constant 0 : index
    %c6 = arith.constant 6 : index
    %15 = vector.load %arg4[%c0_14, %c6] : memref<16x8xf32, #tpu.memory_space<vmem>>, vector<16x1xf32>
    %16 = vector.broadcast %15 : vector<16x1xf32> to vector<16x32xf32>
    %17 = arith.addf %14, %16 : vector<16x32xf32>
    %18 = vector.extract_strided_slice %13 {offsets = [0, 0], sizes = [16, 32], strides = [1, 1]} : vector<32x32xf32> to vector<16x32xf32>
    %c0_15 = arith.constant 0 : index
    %c0_16 = arith.constant 0 : index
    %19 = vector.load %arg4[%c0_15, %c0_16] : memref<16x8xf32, #tpu.memory_space<vmem>>, vector<16x1xf32>
    %20 = vector.broadcast %19 : vector<16x1xf32> to vector<16x32xf32>
    %21 = arith.addf %18, %20 : vector<16x32xf32>
    %cst_17 = arith.constant 0.000000e+00 : f32
    %22 = vector.broadcast %cst_17 : f32 to vector<16x32xf32>
    %23 = arith.maximumf %21, %22 : vector<16x32xf32>
    %c0_18 = arith.constant 0 : index
    %c1 = arith.constant 1 : index
    %24 = vector.load %arg4[%c0_18, %c1] : memref<16x8xf32, #tpu.memory_space<vmem>>, vector<16x1xf32>
    %25 = vector.broadcast %24 : vector<16x1xf32> to vector<16x32xf32>
    %26 = arith.mulf %25, %23 : vector<16x32xf32>
    %c0_19 = arith.constant 0 : index
    %c2_20 = arith.constant 2 : index
    %27 = vector.load %arg4[%c0_19, %c2_20] : memref<16x8xf32, #tpu.memory_space<vmem>>, vector<16x1xf32>
    %28 = vector.broadcast %27 : vector<16x1xf32> to vector<16x32xf32>
    %29 = arith.addf %26, %28 : vector<16x32xf32>
    %30 = arith.truncf %29 : vector<16x32xf32> to vector<16x32xbf16>
    %cst_21 = arith.constant 0.000000e+00 : bf16
    %31 = vector.broadcast %cst_21 : bf16 to vector<16x4xbf16>
    %c0_22 = arith.constant 0 : index
    %c0_23 = arith.constant 0 : index
    %32 = vector.load %arg7[%c0_22, %c0_23] : memref<48x32xbf16, #tpu.memory_space<vmem>>, vector<16x4xbf16>
    tpu.vector_store %arg7[%c0_22, %c0_23], %31 {strides = array<i32>} : memref<48x32xbf16, #tpu.memory_space<vmem>>, vector<16x4xbf16>,
    %33 = vector.extract_strided_slice %30 {offsets = [0, 0], sizes = [16, 28], strides = [1, 1]} : vector<16x32xbf16> to vector<16x28xbf16>
    %c0_24 = arith.constant 0 : index
    %c4_25 = arith.constant 4 : index
    %34 = vector.load %arg7[%c0_24, %c4_25] : memref<48x32xbf16, #tpu.memory_space<vmem>>, vector<16x28xbf16>
    tpu.vector_store %arg7[%c0_24, %c4_25], %33 {strides = array<i32>} : memref<48x32xbf16, #tpu.memory_space<vmem>>, vector<16x28xbf16>,
    %cst_26 = arith.constant 0.000000e+00 : bf16
    %35 = vector.broadcast %cst_26 : bf16 to vector<16x2xbf16>
    %c16_27 = arith.constant 16 : index
    %c0_28 = arith.constant 0 : index
    %36 = vector.load %arg7[%c16_27, %c0_28] : memref<48x32xbf16, #tpu.memory_space<vmem>>, vector<16x2xbf16>
    tpu.vector_store %arg7[%c16_27, %c0_28], %35 {strides = array<i32>} : memref<48x32xbf16, #tpu.memory_space<vmem>>, vector<16x2xbf16>,
    %37 = vector.extract_strided_slice %30 {offsets = [0, 0], sizes = [16, 30], strides = [1, 1]} : vector<16x32xbf16> to vector<16x30xbf16>
    %c16_29 = arith.constant 16 : index
    %c2_30 = arith.constant 2 : index
    %38 = vector.load %arg7[%c16_29, %c2_30] : memref<48x32xbf16, #tpu.memory_space<vmem>>, vector<16x30xbf16>
    tpu.vector_store %arg7[%c16_29, %c2_30], %37 {strides = array<i32>} : memref<48x32xbf16, #tpu.memory_space<vmem>>, vector<16x30xbf16>,
    %c32 = arith.constant 32 : index
    %c0_31 = arith.constant 0 : index
    %39 = vector.load %arg7[%c32, %c0_31] : memref<48x32xbf16, #tpu.memory_space<vmem>>, vector<16x32xbf16>
    tpu.vector_store %arg7[%c32, %c0_31], %30 {strides = array<i32>} : memref<48x32xbf16, #tpu.memory_space<vmem>>, vector<16x32xbf16>,
    %c0_32 = arith.constant 0 : index
    %c0_33 = arith.constant 0 : index
    %40 = vector.load %arg3[%c0_32, %c0_33] : memref<16x48xbf16, #tpu.memory_space<vmem>>, vector<16x48xbf16>
    %c0_34 = arith.constant 0 : index
    %c0_35 = arith.constant 0 : index
    %41 = vector.load %arg7[%c0_34, %c0_35] : memref<48x32xbf16, #tpu.memory_space<vmem>>, vector<48x32xbf16>
    %cst_36 = arith.constant dense<0.000000e+00> : vector<16x32xf32>
    %42 = tpu.matmul %40, %41, %cst_36 {dimension_numbers = #tpu.dot_dimension_numbers<[1], [0], [0], [1], [0, 0, 1, 1], [], []>} : vector<16x48xbf16>, vector<48x32xbf16>, vector<16x32xf32> -> vector<16x32xf32>
    %c0_37 = arith.constant 0 : index
    %c3 = arith.constant 3 : index
    %43 = vector.load %arg4[%c0_37, %c3] : memref<16x8xf32, #tpu.memory_space<vmem>>, vector<16x1xf32>
    %44 = vector.broadcast %43 : vector<16x1xf32> to vector<16x32xf32>
    %45 = arith.addf %42, %44 : vector<16x32xf32>
    %cst_38 = arith.constant 0.000000e+00 : f32
    %46 = vector.broadcast %cst_38 : f32 to vector<16x32xf32>
    %47 = arith.maximumf %45, %46 : vector<16x32xf32>
    %c0_39 = arith.constant 0 : index
    %c4_40 = arith.constant 4 : index
    %48 = vector.load %arg4[%c0_39, %c4_40] : memref<16x8xf32, #tpu.memory_space<vmem>>, vector<16x1xf32>
    %49 = vector.broadcast %48 : vector<16x1xf32> to vector<16x32xf32>
    %50 = arith.mulf %49, %47 : vector<16x32xf32>
    %51 = arith.addf %17, %50 : vector<16x32xf32>
    %c0_41 = arith.constant 0 : index
    %c5 = arith.constant 5 : index
    %52 = vector.load %arg4[%c0_41, %c5] : memref<16x8xf32, #tpu.memory_space<vmem>>, vector<16x1xf32>
    %53 = vector.broadcast %52 : vector<16x1xf32> to vector<16x32xf32>
    %54 = arith.addf %51, %53 : vector<16x32xf32>
    %cst_42 = arith.constant 0.000000e+00 : f32
    %55 = vector.broadcast %cst_42 : f32 to vector<16x32xf32>
    %56 = arith.maximumf %54, %55 : vector<16x32xf32>
    %c0_43 = arith.constant 0 : index
    %c0_44 = arith.constant 0 : index
    %c0_45 = arith.constant 0 : index
    %57 = vector.load %arg5[%c0_43, %c0_44, %c0_45] : memref<1x16x32xf32, #tpu.memory_space<vmem>>, vector<1x16x32xf32>
    %58 = vector.shape_cast %57 : vector<1x16x32xf32> to vector<16x32xf32>
    %59 = vector.shape_cast %56 : vector<16x32xf32> to vector<1x16x32xf32>
    tpu.vector_store %arg5[%c0_43, %c0_44, %c0_45], %59 {strides = array<i32>} : memref<1x16x32xf32, #tpu.memory_space<vmem>>, vector<1x16x32xf32>,
    return
  }
  func.func @transform_0(%arg0: i32) -> (i32, i32, i32) {
    %c0_i32 = arith.constant 0 : i32
    %c0_i32_0 = arith.constant 0 : i32
    %c0_i32_1 = arith.constant 0 : i32
    return %arg0, %c0_i32, %c0_i32_0 : i32, i32, i32
  }
  func.func @transform_1(%arg0: i32) -> (i32, i32) {
    %c0_i32 = arith.constant 0 : i32
    %c0_i32_0 = arith.constant 0 : i32
    %c0_i32_1 = arith.constant 0 : i32
    return %c0_i32, %c0_i32_0 : i32, i32
  }
  func.func @transform_2(%arg0: i32) -> (i32, i32) {
    %c0_i32 = arith.constant 0 : i32
    %c0_i32_0 = arith.constant 0 : i32
    %c0_i32_1 = arith.constant 0 : i32
    return %c0_i32, %c0_i32_0 : i32, i32
  }
  func.func @transform_3(%arg0: i32) -> (i32, i32) {
    %c0_i32 = arith.constant 0 : i32
    %c0_i32_0 = arith.constant 0 : i32
    %c0_i32_1 = arith.constant 0 : i32
    return %c0_i32, %c0_i32_0 : i32, i32
  }
  func.func @transform_4(%arg0: i32) -> (i32, i32, i32) {
    %c0_i32 = arith.constant 0 : i32
    %c0_i32_0 = arith.constant 0 : i32
    %c0_i32_1 = arith.constant 0 : i32
    return %arg0, %c0_i32, %c0_i32_0 : i32, i32, i32
  }
}

</mosaic_0001>

<bundles_post_ra>
// kernel: tpu_custom_call.1
= control target key start
LH: loop header
LB: loop body
LE: loop exit
PB: predicated region body
PF: predicated region fallthrough
CT: control target
= control target key end

     0   :  { %9 = vsyncpa [#allocation5], 0  ;;  %s912_s0 = inlined_call_operand.vmem [shape: bf16[2,8,32], index: 0, kind: input, shape index: {}]   ;;  %s913_s1 = inlined_call_operand.vmem [shape: bf16[32,24], index: 1, kind: input, shape index: {}]   ;;  %s914_s2 = inlined_call_operand.vmem [shape: bf16[16,48], index: 2, kind: input, shape index: {}]   ;;  %s915_s3 = inlined_call_operand.vmem [shape: f32[16,8], index: 3, kind: input, shape index: {}]   ;;  %s916_s4 = inlined_call_operand.hbm [shape: f32[2,16,32], index: 4, kind: output, shape index: {}]  }
   0x1   :  { %11 = vsyncpa [#allocation5 + $0x1], 0  ;;  %s752_s15 = smov 0   ;;  %s754_s16 = smov 0  }
   0x2   :  { %s756_s17 = smov 0   ;;  %s758_s18 = smov 0  }
   0x3 LB: > { %s773_s19 = sadd.s32 4294967295, %s711_s18   ;;  %s533_s20 = sadd.s32 4294967294, %s711_s18   ;;  %s711_s18 = sphi %s758_s18, %s922_s18   ;;  %s707_s17 = sphi %s756_s17, %s921_s17   ;;  %s703_s16 = sphi %s754_s16, %s920_s16   ;;  %s699_s15 = sphi %s752_s15, %s919_s15  }
   0x4   : > { %s777_s21 = sadd.s32 1, %s711_s18   ;;  %s113_s22 = sadd.s32 1, %s707_s17 }
   0x5   : > { %s110_s23 = ssub.s32 %s711_s18, %s777_s21  ;;  %p123_p0 = scmp.ne.s32.totalorder %s707_s17, %s703_s16 }
   0x6   : > { %p111_p1 = scmp.eq.s32.totalorder %s110_s23, 0  ;;  %p124_p2 = scmp.eq.s32.totalorder %s773_s19, 1 }
   0x7   : > { %p129_p3 = scmp.ne.s32.totalorder %s703_s16, %s699_s15  ;;  %p130_p4 = scmp.eq.s32.totalorder %s533_s20, 1 }
   0x8   : > { %s788_s24 = scalar_select %p111_p1, %s707_s17, %s113_s22  }
   0x9   : > { %p790_p5 = por %p124_p2, %p123_p0  ;;  %p794_p6 = por %p130_p4, %p129_p3 }
   0xa   : > { %p536_p7 = scmp.ge.s32.totalorder %s711_s18, 1  ;;  %p164_p8 = scmp.lt.s32.totalorder %s711_s18, 3 }
   0xc   : > { %p165_p9 = pnand %p536_p7, %p164_p8 }
   0xd   : > { %p189_p10 = scmp.lt.s32.totalorder (!%p165_p9), %s773_s19, 1  ;;  %vm195_vm0 = vcmask (!%p165_p9), 27648   ;;  %v713_v0 = vmov (!%p165_p9), 0   ;;  %vm203_vm1 = vcmask (!%p165_p9), 11264   ;;  %vm210_vm2 = vcmask (!%p165_p9), 257024   ;;  %s714_s6 = smov (!%p165_p9), 4  }
   0xe   : > { %168 = sbr.rel (%p165_p9) target bundleno = 761 (0x2f9), region = 36  ;;  %196 = vst.msk [vmem:[#allocation2] sm:$0xf] (!%p165_p9), %vm195_vm0, %v713_v0  ;;  %632 = vset.pattern.permute.xlu1 (!%p165_p9), %v713_v0  ;;  %s715_s7 = smov (!%p165_p9), 2   ;;  %v646_v2 = vld [vmem:[%s913_s1] sm:$0xff] (!%p165_p9)   ;;  %vm238_vm3 = vcmask (!%p165_p9), 195584  }
   0xf   : > { %204 = vst.msk [vmem:[#allocation2 + $0x4] sm:$0xf] (!%p165_p9), %vm203_vm1, %v713_v0  ;;  %565 = vmatprep.mubr.msk.bf16.mxu0 (!%p165_p9), %vm238_vm3, %v646_v2  ;;  %v817_v3 = vld [vmem:[%s915_s3] sm:$0xff] (!%p165_p9)  ;;  %v716_v4 = vmov (!%p165_p9), 1   ;;  %v824_v5 = vld [vmem:[%s915_s3 + $0x8] sm:$0xff] (!%p165_p9)  ;;  %v717_v6 = vmov (!%p165_p9), 2  }
  0x10   : > { %633 = vset.pattern.permute.xlu0 (!%p165_p9), %v716_v4  ;;  %313 = vperm.xlu1 (!%p165_p9), %632, %v817_v3   ;;  %v718_v7 = vmov (!%p165_p9), 3   ;;  %v719_v8 = vmov (!%p165_p9), 6   ;;  %vm201_vm4 = vcmask (!%p165_p9), 257056   ;;  %vm208_vm5 = vcmask (!%p165_p9), 257040   ;;  %v647_v14 = vld [vmem:[%s913_s1 + $0x8] sm:$0xff] (!%p165_p9)   ;;  %v648_v42 = vld [vmem:[%s914_s2] sm:$0xff] (!%p165_p9)  }
  0x11   : > { %vm245_vm6 = vcmask (!%p165_p9), 1043456   ;;  %vm345_vm7 = vcmask (!%p165_p9), 31744   ;;  %vm353_vm8 = vcmask (!%p165_p9), 15360   ;;  %v720_v28 = vmov (!%p165_p9), 0.0   ;;  %s724_s10 = smov (!%p165_p9), [#allocation4]  }
  0x12   : > { %346 = vst.msk [vmem:[#allocation3] sm:$0xff] (!%p165_p9), %vm345_vm7, %v713_v0  ;;  %569 = vmatprep.subr.bf16.mxu1 (!%p165_p9), %v720_v28  ;;  %vm360_vm9 = vcmask (!%p165_p9), 261120   ;;  %vm721_vm10 = vmmov (!%p165_p9), 0   ;;  %v722_v35 = vmov (!%p165_p9), 5   ;;  %v723_v36 = vmov (!%p165_p9), 4   ;;  %s653_s11 = sshll.u32 (!%p165_p9), %s724_s10, 4  ;;  %s654_s11 = int_to_ptr.vmem [resolvable:$false] %s653_s11 }
  0x13   : > { %354 = vst.msk [vmem:[#allocation3 + $0x8] sm:$0xff] (!%p165_p9), %vm353_vm8, %v713_v0  ;;  %575 = vmatprep.mubr.msk.bf16.mxu1 (!%p165_p9), %vm721_vm10, %v720_v28  ;;  %vm351_vm11 = vcmask (!%p165_p9), 261152   ;;  %vm358_vm12 = vcmask (!%p165_p9), 261136   ;;  %vm384_vm13 = vcmask (!%p165_p9), 392192   ;;  %s655_s12 = scalar_lea.vmem (!%p165_p9), %s654_s11, 512 }
  0x14   : > { %317 = vperm.xlu1 (!%p165_p9), %632, %v824_v5  }
  0x15   : > { %s190_s27 = scalar_select %p189_p10, %s773_s19, 1 }
  0x17   : > { %s538_s28 = sshll.u32 %s190_s27, 2  ;;  %s186_s27 = sand.u32 1, %s703_s16  }
  0x18   : > { %s192_s5 = scalar_lea.vmem %s912_s0, %s538_s28  ;;  %634 = vset.pattern.permute.xlu1 %v716_v4  ;;  %s537_s28 = sshll.u32 %s186_s27, 4 }
  0x19   : > { %v194_v1 = vld [vmem:[%s192_s5] sm:$0xf]  ;;  %329 = vperm.xlu1 %634, %v824_v5   ;;  %s188_s29 = scalar_lea.vmem [#allocation4], %s537_s28  ;;  %s552_s5 = sshll.u32 %s773_s19, 8 }
  0x1a   : > { %198 = vrot.lane.b32.xlu0 %v194_v1, %s714_s6  ;;  %211 = vst.msk [vmem:[#allocation2 + $0x8] sm:$0xf] %vm210_vm2, %v194_v1  ;;  %s471_s30 = sshll.u32 %s188_s29, 4  ;;  %s865_s8 = scalar_lea.hbm %s916_s4, %s552_s5  ;;  %s860_s30 = int_to_ptr.vmem [resolvable:$true] %s471_s30 }
  0x1b   : > { %s871_s9 = scalar_lea.sflag [#allocation5], %s186_s27  ;;  %s649_s19 = scalar_lea.vmem %s860_s30, 256 }
  0x1c   : > { %p650_p11 = scmp.ne.s32.totalorder %s860_s30, %s649_s19  ;;  %p656_p0 = scmp.lt.s32.totalorder %s860_s30, %s654_s11 }
  0x1d   : > { %635 = vset.pattern.permute.xlu1 %v717_v6  ;;  %p657_p1 = scmp.lt.s32.totalorder %s655_s12, %s649_s19 }
  0x1e   : > { %205 = vrot.lane.b32.xlu0 %v194_v1, %s715_s7  ;;  %335 = vperm.xlu1 %635, %v817_v3   ;;  %p651_p12 = pnand %p650_p11, %p790_p5 }
  0x1f   : > { %p658_p2 = por %p657_p1, %p656_p0 }
  0x20   : > { %p652_p13 = pneg %p651_p12 }
  0x21   : > { %v645_v12 = vld [vmem:[#allocation2 + $0x8] ss:$0 sps:$4 sm:$0xff]  }
  0x22   : > { %325 = vperm.xlu0 %633, %v817_v3   ;;  %638 = vset.pattern.permute.xlu1 %v718_v7  ;;  %v247_v13 = vsel %vm245_vm6, %v645_v12, 0  ;;  %p659_p3 = pnand %p658_p2, %p652_p13 }
  0x26   : > { %636 = vset.pattern.permute.xlu0 %v717_v6 }
  0x27   : > { %339 = vperm.xlu0 %636, %v824_v5  }
  0x2b   : > { %637 = vset.pattern.permute.xlu0 %v718_v7 }
  0x2c   : > { %371 = vperm.xlu0 %637, %v817_v3  }
  0x30   : > { %640 = vset.pattern.permute.xlu0 %v719_v8 }
  0x31   : > { %307 = vperm.xlu0 %640, %v824_v5  }
  0x35   : > { %642 = vset.pattern.permute.xlu0 %v722_v35 }
  0x36   : > { %444 = vperm.xlu0 %642, %v817_v3  }
  0x8c   : > { %v199_v9 = vpop.permute.xlu0 %198 }
  0x8d   : > { %202 = vst.msk [vmem:[#allocation2] sm:$0xf] %vm201_vm4, %v199_v9 }
  0x8f   : > { %v314_v15 = vpop.permute.xlu1 %313 }
  0x90   : > { %v206_v10 = vpop.permute.xlu0 %205 }
  0x91   : > { %209 = vst.msk [vmem:[#allocation2 + $0x4] sm:$0xf] %vm208_vm5, %v206_v10 }
  0x93   : > { %v318_v16 = vpop.permute.xlu1 %317 }
  0x98   : > { %v644_v11 = vld [vmem:[#allocation2] sm:$0xff]   ;;  %v330_v19 = vpop.permute.xlu1 %329 }
  0x99   : > { %561 = vmatprep.subr.bf16.mxu0 %v644_v11 }
  0x9a   : > { %562 = vmatpush3.bf16.msra.mxu0 %v644_v11 }
  0x9b   : > { %579 = vmatprep.subr.msk.bf16.mxu0 %vm245_vm6, %v645_v12 }
  0x9d   : > { %v336_v29 = vpop.permute.xlu1 %335 }
  0x9e   : > { %564 = vmatpush3.bf16.msra.mxu0 %v247_v13 }
  0xa1   : > { %566 = vmatmul.mubr.msk.bf16.vlgmr.msra.gmra.mrb[0].mxu0 %vm238_vm3, %v647_v14  ;;  %v326_v22 = vpop.permute.xlu0 %325 }
  0xa6   : > { %v340_v31 = vpop.permute.xlu0 %339 }
  0xab   : > { %v372_v45 = vpop.permute.xlu0 %371 }
  0xb0   : > { %v308_v50 = vpop.permute.xlu0 %307 }
  0xb5   : > { %v445_v59 = vpop.permute.xlu0 %444 }
 0x174   : > { %v837_v17 = vpop.f32.mrb[0].mxu0 }
 0x175   : > { %v283_v18 = vpop.f32.mrb[1].mxu0 }
 0x176   : > { %v320_v20 = vadd.f32 %v314_v15, %v283_v18  ;;  %v839_v21 = vpop.f32.mrb[2].mxu0 }
 0x177   : > { %v286_v23 = vpop.f32.mrb[3].mxu0  ;;  %v311_v60 = vadd.f32 %v839_v21, %v308_v50 }
 0x178   : > { %v322_v24 = vmax.f32 %v320_v20, 0.0  ;;  %v321_v25 = vadd.f32 %v318_v16, %v286_v23 }
 0x17a   : > { %v323_v26 = vmax.f32 %v321_v25, 0.0  ;;  %v332_v27 = vmul.f32 %v326_v22, %v322_v24 }
 0x17c   : > { %v333_v30 = vmul.f32 %v330_v19, %v323_v26  ;;  %v342_v32 = vadd.f32 %v336_v29, %v332_v27 }
 0x17e   : > { %v343_v33 = vadd.f32 %v340_v31, %v333_v30 }
 0x180   : > { %v344_v34 = vpack.c.bf16 %v343_v33, %v342_v32 }
 0x182   : > { %361 = vst.msk [vmem:[#allocation3 + $0x10] sm:$0xff] %vm360_vm9, %v344_v34  ;;  %348 = vrot.lane.b32.xlu1 %v344_v34, %s714_s6 }
 0x186   : > { %355 = vrot.lane.b32.xlu1 %v344_v34, %s715_s7 }
 0x189   : > { %v366_v41 = vld [vmem:[#allocation3 + $0x10] sm:$0xff] }
 0x18a   : > { %376 = vperm.xlu1 %638, %v824_v5  }
 0x18e   : > { %639 = vset.pattern.permute.xlu1 %v719_v8 }
 0x18f   : > { %302 = vperm.xlu1 %639, %v817_v3  }
 0x193   : > { %641 = vset.pattern.permute.xlu1 %v723_v36 }
 0x194   : > { %432 = vperm.xlu1 %641, %v817_v3  }
 0x198   : > { %436 = vperm.xlu1 %641, %v824_v5  }
 0x19c   : > { %643 = vset.pattern.permute.xlu1 %v722_v35 }
 0x19d   : > { %448 = vperm.xlu1 %643, %v824_v5  }
 0x1f4   : > { %v349_v37 = vpop.permute.xlu1 %348 }
 0x1f5   : > { %352 = vst.msk [vmem:[#allocation3] sm:$0xff] %vm351_vm11, %v349_v37 }
 0x1f8   : > { %v356_v38 = vpop.permute.xlu1 %355 }
 0x1f9   : > { %359 = vst.msk [vmem:[#allocation3 + $0x8] sm:$0xff] %vm358_vm12, %v356_v38 }
 0x1fc   : > { %v364_v39 = vld [vmem:[#allocation3] sm:$0xff] }
 0x1fd   : > { %570 = vmatpush3.bf16.msra.mxu1 %v364_v39 }
 0x1fe   : > { %571 = vmatprep.subr.bf16.mxu1 %v720_v28 }
 0x200   : > { %v365_v40 = vld [vmem:[#allocation3 + $0x8] sm:$0xff] }
 0x201   : > { %572 = vmatpush3.bf16.msra.mxu1 %v365_v40 }
 0x202   : > { %573 = vmatprep.subr.bf16.mxu1 %v720_v28 }
 0x205   : > { %574 = vmatpush3.bf16.msra.mxu1 %v366_v41 }
 0x208   : > { %576 = vmatmul.mubr.msk.bf16.vlgmr.msra.gmra.mrb[0].mxu1 %vm384_vm13, %v648_v42 }
 0x209   : > { %v377_v43 = vpop.permute.xlu1 %376 }
 0x20e   : > { %v303_v44 = vpop.permute.xlu1 %302 }
 0x20f   : > { %v310_v56 = vadd.f32 %v837_v17, %v303_v44 }
 0x213   : > { %v433_v46 = vpop.permute.xlu1 %432 }
 0x217   : > { %v437_v55 = vpop.permute.xlu1 %436 }
 0x21c   : > { %v449_v63 = vpop.permute.xlu1 %448 }
 0x2db   : > { %v422_v47 = vpop.f32.mrb[0].mxu1 }
 0x2dc   : > { %v423_v48 = vadd.f32 %v422_v47, %v372_v45  ;;  %v577_v49 = vpop.f32.mrb[1].mxu1 }
 0x2dd   : > { %v425_v51 = vpop.f32.mrb[2].mxu1 }
 0x2de   : > { %v429_v52 = vmax.f32 %v423_v48, 0.0  ;;  %v426_v53 = vadd.f32 %v425_v51, %v377_v43  ;;  %v578_v54 = vpop.f32.mrb[3].mxu1 }
 0x2e0   : > { %v439_v57 = vmul.f32 %v433_v46, %v429_v52  ;;  %v430_v58 = vmax.f32 %v426_v53, 0.0 }
 0x2e2   : > { %v440_v61 = vmul.f32 %v437_v55, %v430_v58  ;;  %v441_v62 = vadd.f32 %v439_v57, %v310_v56 }
 0x2e4   : > { %v451_v0 = vadd.f32 %v445_v59, %v441_v62  ;;  %v442_v1 = vadd.f32 %v440_v61, %v311_v60 }
 0x2e6   : > { %v453_v2 = vmax.f32 %v451_v0, 0.0  ;;  %v452_v3 = vadd.f32 %v449_v63, %v442_v1 }
 0x2e8   : > { %455 = vst.msk [vmem:[%s188_s29] sm:$0xff] %vm360_vm9, %v453_v2  ;;  %v454_v4 = vmax.f32 %v452_v3, 0.0 }
 0x2ea   : > { %456 = vst.msk [vmem:[%s188_s29 + $0x8] sm:$0xff] %vm360_vm9, %v454_v4 }
 0x2eb   : > { %662 = shalt.err (!%p659_p3)
}
 0x2ec   : > { %s663_s13 = scalar_lea.hbm %s865_s8, 256  ;;  %s667_s22 = scalar_lea.hbm %s916_s4, 512 }
 0x2ed   : > { %p664_p4 = scmp.ne.s32.totalorder %s865_s8, %s663_s13  ;;  %p668_p9 = scmp.lt.u32.totalorder %s865_s8, %s916_s4 }
 0x2ee   : > { %p669_p10 = scmp.lt.u32.totalorder %s667_s22, %s663_s13  ;;  %p671_p12 = scmp.lt.u32.totalorder %s663_s13, %s865_s8 }
 0x2ef   : > { %p665_p7 = pnand %p664_p4, %p790_p5 }
 0x2f0   : > { %p670_p11 = por %p669_p10, %p668_p9 }
 0x2f1   : > { %p666_p8 = pneg %p665_p7 }
 0x2f2   : > { %p672_p13 = por %p671_p12, %p670_p11 }
 0x2f4   : > { %p673_p0 = pnand %p672_p13, %p666_p8 }
 0x2f6   : > { %676 = shalt.err (!%p673_p0)
}
 0x2f7   : > { %s725_s28 = smov 128   ;;  %s726_s29 = smov 8  }
 0x2f8   : > { %580 = dma.vmem_to_hbm [thread:$0]  (%p790_p5), %s860_s30, 256, %s865_s8, %s871_s9, %s725_s28, %s725_s28, %s726_s29  }
 0x2f9 PF: > { %p586_p1 = scmp.ge.s32.totalorder %s711_s18, 2  ;;  %s486_s5 = sand.u32 1, %s699_s15  }
 0x2fa   : > { %s487_s6 = scalar_lea.sflag [#allocation5], %s486_s5 }
 0x2fb   : > { %p583_p2 = pnand %p586_p1, %p794_p6 }
 0x2fd   : > { %694 = dma.done.wait (!%p583_p2), %s487_s6, 256  }
 0x2fe   : > { %696 = vsyncadd (!%p583_p2), %s487_s6, 4294967040  ;;  %p14_p3 = scmp.ge.s32.totalorder %s777_s21, 4   ;;  %s919_s15 = smov %s703_s16 }
 0x2ff   : > { %s920_s16 = smov %s707_s17  ;;  %s921_s17 = smov %s788_s24 }
 0x300   : > { %s922_s18 = smov %s777_s21  ;;  %16 = sbr.rel (!%p14_p3) target bundleno = 3 (0x3), region = 71 }
 0x307   :  { %492 = vsyncpa [#allocation5], 1 }
 0x308   :  { %494 = vsyncpa [#allocation5 + $0x1], 1 }

</bundles_post_ra>
